<compile_context>
chip_gen: v6e
topology: v6e:2x2x1
jax: 0.10.0
libtpu: 0.0.40
codegen_flags: <defaults>
</compile_context>

<pallas_src>
import numpy as np
import jax
import jax.numpy as jnp
from jax.experimental import pallas as pl
from jax.experimental.pallas import tpu as pltpu


def _round_up(x, m):
    return ((x + m - 1) // m) * m


# ----------------------------------------------------------------------------
# Pallas kernel: spectrum chunk = cov_rows @ gram_steer  (single MXU matmul)
# ----------------------------------------------------------------------------
def _spectrum_kernel(cov_ref, steer_ref, out_ref):
    # cov_ref   : (chunk, K_pad)   [Rr_flat, Ri_flat] per batch element
    # steer_ref : (K_pad, A_pad)   [C; -S] Gram-steering dictionary
    # out_ref   : (chunk, A_pad)   real spectrum
    out_ref[...] = jnp.dot(cov_ref[...], steer_ref[...],
                           preferred_element_type=jnp.float32)


# ----------------------------------------------------------------------------
# Init-time constant: Gram-steering dictionary (mirrors __init_steering_dict)
# ----------------------------------------------------------------------------
def make_gram_steering(steer_real, steer_imag):
    """Build the (K_pad, A_pad) Gram-steering matrix [C; -S] (model constant)."""
    N, A = steer_real.shape
    # C[n*N+m, a] = Ar[n,a]Ar[m,a] + Ai[n,a]Ai[m,a]   (pairs with Re(R))
    # S[n*N+m, a] = Ar[n,a]Ai[m,a] - Ai[n,a]Ar[m,a]   (pairs with Im(R))
    C = (steer_real[:, None, :] * steer_real[None, :, :]
         + steer_imag[:, None, :] * steer_imag[None, :, :]).reshape(N * N, A)
    S = (steer_real[:, None, :] * steer_imag[None, :, :]
         - steer_imag[:, None, :] * steer_real[None, :, :]).reshape(N * N, A)
    gram = jnp.concatenate([C, -S], axis=0)                       # (2N^2, A)

    k = 2 * N * N
    k_pad = _round_up(k, 128)
    a_pad = _round_up(A, 128)
    gram = jnp.pad(gram, ((0, k_pad - k), (0, a_pad - A)))        # zero pad
    return gram.astype(jnp.float32)


# ----------------------------------------------------------------------------
# Forward hot path: spectrum[b, a] = Re(a^H R_b a) via one matmul per chunk
# ----------------------------------------------------------------------------
def beamformer_spectrum(cov_real, cov_imag, gram_steer, n_angles, *, chunk=None):
    B, N, _ = cov_real.shape
    k = 2 * N * N
    k_pad, a_pad = gram_steer.shape

    # One lane-dense row per batch element: [Rr_flat, Ri_flat].
    cov_rows = jnp.concatenate(
        [cov_real.reshape(B, N * N), cov_imag.reshape(B, N * N)], axis=-1)
    if k_pad != k:
        cov_rows = jnp.pad(cov_rows, ((0, 0), (0, k_pad - k)))
    cov_rows = cov_rows.astype(jnp.float32)

    # Batch chunk per grid step: fold as much batch as possible into the
    # matmul M dimension (per-step overhead ~0.35us, tiles are tiny here).
    if chunk is None:
        chunk = _round_up(B, 8) if B <= 1024 else 512
    b_pad = _round_up(B, chunk)
    if b_pad != B:
        cov_rows = jnp.pad(cov_rows, ((0, b_pad - B), (0, 0)))

    spec_pad = pl.pallas_call(
        _spectrum_kernel,
        out_shape=jax.ShapeDtypeStruct((b_pad, a_pad), jnp.float32),
        grid_spec=pltpu.PrefetchScalarGridSpec(
            num_scalar_prefetch=0,
            grid=(b_pad // chunk,),
            in_specs=[
                # one covariance DMA per step (chunk rows, lane-dense K)
                pl.BlockSpec((chunk, k_pad), lambda b: (b, 0)),
                # Gram-steering dict: constant index_map -> VMEM-resident
                pl.BlockSpec((k_pad, a_pad), lambda b: (0, 0)),
            ],
            out_specs=pl.BlockSpec((chunk, a_pad), lambda b: (b, 0)),
        ),
        compiler_params=pltpu.CompilerParams(
            dimension_semantics=("parallel",)),
    )(cov_rows, gram_steer)

    # Drop batch padding and zero-padded angle bins (avoids spurious peaks).
    return spec_pad[:B, :n_angles]


# ----------------------------------------------------------------------------
# Glue (plain JAX): peak finding + label gather (data-dependent, not hot path)
# ----------------------------------------------------------------------------
def find_peaks_far_field(spectrum, sources_num):
    """Top-`sources_num` strict local maxima of the spectrum, sorted by height."""
    # TODO(synk): the torch fallback (topk of angles_dict when too few peaks
    # are found) is not reproduced; here non-peak bins simply rank at -inf.
    left = spectrum[:, 1:-1] > spectrum[:, :-2]
    right = spectrum[:, 1:-1] > spectrum[:, 2:]
    is_peak = jnp.pad(left & right, ((0, 0), (1, 1)), constant_values=False)
    masked = jnp.where(is_peak, spectrum, -jnp.inf)
    _, idx = jax.lax.top_k(masked, sources_num)
    return idx


def get_labels(angles_dict, peaks):
    return angles_dict[peaks]


def beamformer_forward(cov_real, cov_imag, gram_steer, angles_dict, sources_num):
    spectrum = beamformer_spectrum(cov_real, cov_imag, gram_steer,
                                   n_angles=angles_dict.shape[0])
    peaks = find_peaks_far_field(spectrum, sources_num)
    labels = get_labels(angles_dict, peaks)
    return labels, spectrum


# ----------------------------------------------------------------------------
# Deterministic setup (mirrors __init_grid_params / __init_steering_dict for
# a far-field ULA with half-wavelength spacing)
# ----------------------------------------------------------------------------
def make_angles_dict(doa_range_deg=60.0, doa_resolution_deg=1.0):
    angle_range = np.deg2rad(doa_range_deg)
    angle_res = np.deg2rad(doa_resolution_deg / 2.0)
    return jnp.asarray(
        np.arange(-angle_range, angle_range + angle_res, angle_res),
        dtype=jnp.float32)


def make_steering_dict(angles, n_sensors):
    # Far-field ULA nominal steering vector: a_n(theta) = exp(-j * pi * n * sin(theta))
    n = jnp.arange(n_sensors, dtype=jnp.float32)[:, None]           # (N, 1)
    phase = -jnp.pi * n * jnp.sin(angles)[None, :]                  # (N, A)
    return jnp.cos(phase), jnp.sin(phase)                           # real, imag


def sample_covariance(x_real, x_imag):
    # cov = x x^H / T  (Hermitian), split into real/imag parts.
    T = x_real.shape[-1]
    cr = (jnp.einsum('bnt,bmt->bnm', x_real, x_real)
          + jnp.einsum('bnt,bmt->bnm', x_imag, x_imag)) / T
    ci = (jnp.einsum('bnt,bmt->bnm', x_imag, x_real)
          - jnp.einsum('bnt,bmt->bnm', x_real, x_imag)) / T
    return cr, ci


if __name__ == "__main__":
    B = 2          # batch
    N = 8          # sensors
    T = 64         # snapshots
    sources_num = 2

    angles_dict = make_angles_dict(doa_range_deg=60.0, doa_resolution_deg=1.0)
    A = angles_dict.shape[0]
    steer_real, steer_imag = make_steering_dict(angles_dict, N)

    # Init-time constant (equivalent of Beamformer.__init_steering_dict).
    gram_steer = make_gram_steering(steer_real, steer_imag)

    key = jax.random.PRNGKey(0)
    k1, k2 = jax.random.split(key)
    x_real = jax.random.normal(k1, (B, N, T), dtype=jnp.float32)
    x_imag = jax.random.normal(k2, (B, N, T), dtype=jnp.float32)
    cov_real, cov_imag = sample_covariance(x_real, x_imag)

    labels, spectrum = beamformer_forward(
        cov_real, cov_imag, gram_steer, angles_dict, sources_num)
    labels = jax.block_until_ready(labels)
    spectrum = jax.block_until_ready(spectrum)

    # Sanity check against a plain-JAX (complex) reference of get_spectrum.
    steer_c = steer_real + 1j * steer_imag
    cov_c = cov_real + 1j * cov_imag
    ref_spec = jnp.real(
        jnp.einsum('na,bnm,ma->ba', jnp.conj(steer_c), cov_c, steer_c))
    np.testing.assert_allclose(np.asarray(spectrum), np.asarray(ref_spec),
                               rtol=1e-4, atol=1e-3)

    assert labels.shape == (B, sources_num)
    assert spectrum.shape == (B, A)
    print("KERNEL_OK")
</pallas_src>

<mosaic_0001>
module attributes {stable_mosaic.version = 11 : i64} {
  func.func @_spectrum_kernel(%arg0: i32, %arg1: memref<8x128xf32, #tpu.memory_space<vmem>>, %arg2: memref<128x256xf32, #tpu.memory_space<vmem>>, %arg3: memref<8x256xf32, #tpu.memory_space<vmem>>) attributes {dimension_semantics = [#tpu.dimension_semantics<parallel>], iteration_bounds = array<i64: 1>, scalar_prefetch = 0 : i64, scratch_operands = 0 : i64, tpu.core_type = #tpu.core_type<tc>, window_params = [{transform_indices = @transform_0, window_bounds = array<i64: 8, 128>}, {pipeline_mode = #tpu.pipeline_mode<synchronous>, transform_indices = @transform_1, window_bounds = array<i64: 128, 256>}, {transform_indices = @transform_2, window_bounds = array<i64: 8, 256>}]} {
    %c0 = arith.constant 0 : index
    %c0_0 = arith.constant 0 : index
    %0 = vector.load %arg1[%c0, %c0_0] : memref<8x128xf32, #tpu.memory_space<vmem>>, vector<8x128xf32>
    %c0_1 = arith.constant 0 : index
    %c0_2 = arith.constant 0 : index
    %1 = vector.load %arg2[%c0_1, %c0_2] : memref<128x256xf32, #tpu.memory_space<vmem>>, vector<128x256xf32>
    %cst = arith.constant dense<0.000000e+00> : vector<8x256xf32>
    %2 = tpu.matmul %0, %1, %cst {dimension_numbers = #tpu.dot_dimension_numbers<[1], [0], [0], [1], [0, 0, 1, 1], [], []>} : vector<8x128xf32>, vector<128x256xf32>, vector<8x256xf32> -> vector<8x256xf32>
    %c0_3 = arith.constant 0 : index
    %c0_4 = arith.constant 0 : index
    %3 = vector.load %arg3[%c0_3, %c0_4] : memref<8x256xf32, #tpu.memory_space<vmem>>, vector<8x256xf32>
    tpu.vector_store %arg3[%c0_3, %c0_4], %2 {strides = array<i32>} : memref<8x256xf32, #tpu.memory_space<vmem>>, vector<8x256xf32>,
    return
  }
  func.func @transform_0(%arg0: i32) -> (i32, i32) {
    %c0_i32 = arith.constant 0 : i32
    %c0_i32_0 = arith.constant 0 : i32
    return %arg0, %c0_i32 : i32, i32
  }
  func.func @transform_1(%arg0: i32) -> (i32, i32) {
    %c0_i32 = arith.constant 0 : i32
    %c0_i32_0 = arith.constant 0 : i32
    %c0_i32_1 = arith.constant 0 : i32
    return %c0_i32, %c0_i32_0 : i32, i32
  }
  func.func @transform_2(%arg0: i32) -> (i32, i32) {
    %c0_i32 = arith.constant 0 : i32
    %c0_i32_0 = arith.constant 0 : i32
    return %arg0, %c0_i32 : i32, i32
  }
}

</mosaic_0001>

<bundles_post_ra>
// kernel: tpu_custom_call.1
= control target key start
LH: loop header
LB: loop body
LE: loop exit
PB: predicated region body
PF: predicated region fallthrough
CT: control target
= control target key end

     0   :  { %7 = vsyncpa [#allocation3], 0  ;;  %s262_s0 = inlined_call_operand.hbm [shape: f32[8,128], index: 0, kind: input, shape index: {}]   ;;  %s263_s1 = inlined_call_operand.hbm [shape: f32[128,256], index: 1, kind: input, shape index: {}]   ;;  %s264_s2 = inlined_call_operand.hbm [shape: f32[8,256], index: 2, kind: output, shape index: {}]  }
   0x1   :  { %8 = vsyncpa [#allocation6], 0 }
   0x2   :  { %9 = vsyncpa [#allocation4], 0  ;;  %s232_s9 = smov [#allocation2]   ;;  %s233_s11 = smov [#allocation5]  }
   0x3   :  { %s16_s10 = sshll.u32 %s232_s9, 4  ;;  %s25_s12 = sshll.u32 %s233_s11, 4  ;;  %s17_s10 = int_to_ptr.vmem [resolvable:$true] %s16_s10  ;;  %s26_s12 = int_to_ptr.vmem [resolvable:$true] %s25_s12 }
   0x4   :  { %s174_s13 = scalar_lea.vmem %s17_s10, 128  ;;  %p179_p1 = scmp.lt.s32.totalorder %s17_s10, %s17_s10 }
   0x5   :  { %p175_p0 = scmp.ne.s32.totalorder %s17_s10, %s174_s13  ;;  %p180_p2 = scmp.lt.s32.totalorder %s174_s13, %s174_s13 }
   0x7   :  { %p181_p3 = por %p180_p2, %p179_p1 }
   0x9   :  { %p182_p4 = pnand %p181_p3, %p175_p0 }
   0xb   :  { %185 = shalt.err (!%p182_p4)
}
   0xc   :  { %19 = dma.hbm_to_vmem [thread:$0]  %s262_s0, 128, %s17_s10, [#allocation3]  }
   0xd   :  { %s194_s16 = scalar_lea.vmem %s26_s12, 4096  ;;  %p199_p6 = scmp.lt.s32.totalorder %s26_s12, %s26_s12 }
   0xe   :  { %p195_p5 = scmp.ne.s32.totalorder %s26_s12, %s194_s16  ;;  %p200_p7 = scmp.lt.s32.totalorder %s194_s16, %s194_s16 }
  0x10   :  { %p201_p8 = por %p200_p7, %p199_p6 }
  0x12   :  { %p202_p9 = pnand %p201_p8, %p195_p5 }
  0x14   :  { %205 = shalt.err (!%p202_p9)
}
  0x15   :  { %s234_s17 = smov 256   ;;  %s235_s18 = smov 16  }
  0x16   :  { %31 = dma.hbm_to_vmem [thread:$0]  %s263_s1, 4096, %s26_s12, [#allocation6], %s234_s17, %s234_s17, %s235_s18  }
  0x17   :  { %226 = dma.done.wait [#allocation3], 128  }
  0x18   :  { %227 = vsyncadd [#allocation3], 4294967168 }
  0x19   :  { %228 = dma.done.wait [#allocation6], 4096  }
  0x1a   :  { %229 = vsyncadd [#allocation6], 4294963200  ;;  %v236_v0 = vmov 0.0   ;;  %v70_v1 = vld [vmem:[#allocation5 + $0xf8] sm:$0xff]  ;;  %v69_v2 = vld [vmem:[#allocation5 + $0xf0] sm:$0xff]  ;;  %s237_s0 = smov [#allocation7]  }
  0x1b   :  { %135 = vmatprep.mubr.f32.mxu0 %v236_v0  ;;  %v68_v3 = vld [vmem:[#allocation5 + $0xe8] sm:$0xff]  ;;  %71 = vmatprep.subr.mxu0 %v70_v1  ;;  %v67_v4 = vld [vmem:[#allocation5 + $0xe0] sm:$0xff]  ;;  %v66_v5 = vld [vmem:[#allocation5 + $0xd8] sm:$0xff]  ;;  %s150_s1 = sshll.u32 %s237_s0, 4  ;;  %s151_s1 = int_to_ptr.vmem [resolvable:$true] %s150_s1 }
  0x1c   :  { %72 = vmatpush1.msra.mxu0 %v69_v2  ;;  %v65_v6 = vld [vmem:[#allocation5 + $0xd0] sm:$0xff]  ;;  %v64_v7 = vld [vmem:[#allocation5 + $0xc8] sm:$0xff]  ;;  %v63_v8 = vld [vmem:[#allocation5 + $0xc0] sm:$0xff]  ;;  %s206_s21 = scalar_lea.vmem %s151_s1, 256  ;;  %p211_p11 = scmp.lt.s32.totalorder %s151_s1, %s151_s1 }
  0x1d   :  { %73 = vmatprep.subr.mxu0 %v68_v3  ;;  %v62_v9 = vld [vmem:[#allocation5 + $0xb8] sm:$0xff]  ;;  %v61_v10 = vld [vmem:[#allocation5 + $0xb0] sm:$0xff]  ;;  %v60_v11 = vld [vmem:[#allocation5 + $0xa8] sm:$0xff]  ;;  %p207_p10 = scmp.ne.s32.totalorder %s151_s1, %s206_s21  ;;  %p212_p12 = scmp.lt.s32.totalorder %s206_s21, %s206_s21 }
  0x1e   :  { %74 = vmatpush1.msra.mxu0 %v67_v4  ;;  %v59_v12 = vld [vmem:[#allocation5 + $0xa0] sm:$0xff]  ;;  %v58_v13 = vld [vmem:[#allocation5 + $0x98] sm:$0xff]  ;;  %v57_v14 = vld [vmem:[#allocation5 + $0x90] sm:$0xff] }
  0x1f   :  { %75 = vmatprep.subr.mxu0 %v66_v5  ;;  %v56_v15 = vld [vmem:[#allocation5 + $0x88] sm:$0xff]  ;;  %v55_v16 = vld [vmem:[#allocation5 + $0x80] sm:$0xff]  ;;  %v54_v17 = vld [vmem:[#allocation5 + $0x78] sm:$0xff]  ;;  %p213_p13 = por %p212_p12, %p211_p11 }
  0x20   :  { %76 = vmatpush1.msra.mxu0 %v65_v6  ;;  %v53_v18 = vld [vmem:[#allocation5 + $0x70] sm:$0xff]  ;;  %v52_v19 = vld [vmem:[#allocation5 + $0x68] sm:$0xff]  ;;  %v51_v20 = vld [vmem:[#allocation5 + $0x60] sm:$0xff] }
  0x21   :  { %77 = vmatprep.subr.mxu0 %v64_v7  ;;  %v50_v21 = vld [vmem:[#allocation5 + $0x58] sm:$0xff]  ;;  %v49_v22 = vld [vmem:[#allocation5 + $0x50] sm:$0xff]  ;;  %v48_v23 = vld [vmem:[#allocation5 + $0x48] sm:$0xff]  ;;  %p214_p0 = pnand %p213_p13, %p207_p10 }
  0x22   :  { %78 = vmatpush1.msra.mxu0 %v63_v8  ;;  %v47_v24 = vld [vmem:[#allocation5 + $0x40] sm:$0xff]  ;;  %v46_v25 = vld [vmem:[#allocation5 + $0x38] sm:$0xff]  ;;  %v45_v26 = vld [vmem:[#allocation5 + $0x30] sm:$0xff] }
  0x23   :  { %79 = vmatprep.subr.mxu0 %v62_v9  ;;  %v44_v27 = vld [vmem:[#allocation5 + $0x28] sm:$0xff]  ;;  %v43_v28 = vld [vmem:[#allocation5 + $0x20] sm:$0xff]  ;;  %v42_v29 = vld [vmem:[#allocation5 + $0x18] sm:$0xff] }
  0x24   :  { %80 = vmatpush1.msra.mxu0 %v61_v10  ;;  %v41_v30 = vld [vmem:[#allocation5 + $0x10] sm:$0xff]  ;;  %v40_v31 = vld [vmem:[#allocation5 + $0x8] sm:$0xff]  ;;  %v39_v32 = vld [vmem:[#allocation5] sm:$0xff] }
  0x25   :  { %81 = vmatprep.subr.mxu0 %v60_v11  ;;  %v38_v33 = vld [vmem:[#allocation2] sm:$0xff] }
  0x26   :  { %82 = vmatpush1.msra.mxu0 %v59_v12 }
  0x27   :  { %83 = vmatprep.subr.mxu0 %v58_v13 }
  0x28   :  { %84 = vmatpush1.msra.mxu0 %v57_v14 }
  0x29   :  { %85 = vmatprep.subr.mxu0 %v56_v15 }
  0x2a   :  { %86 = vmatpush1.msra.mxu0 %v55_v16 }
  0x2b   :  { %87 = vmatprep.subr.mxu0 %v54_v17 }
  0x2c   :  { %88 = vmatpush1.msra.mxu0 %v53_v18 }
  0x2d   :  { %89 = vmatprep.subr.mxu0 %v52_v19 }
  0x2e   :  { %90 = vmatpush1.msra.mxu0 %v51_v20 }
  0x2f   :  { %91 = vmatprep.subr.mxu0 %v50_v21 }
  0x30   :  { %92 = vmatpush1.msra.mxu0 %v49_v22 }
  0x31   :  { %93 = vmatprep.subr.mxu0 %v48_v23 }
  0x32   :  { %94 = vmatpush1.msra.mxu0 %v47_v24 }
  0x33   :  { %95 = vmatprep.subr.mxu0 %v46_v25 }
  0x34   :  { %96 = vmatpush1.msra.mxu0 %v45_v26 }
  0x35   :  { %97 = vmatprep.subr.mxu0 %v44_v27 }
  0x36   :  { %98 = vmatpush1.msra.mxu0 %v43_v28 }
  0x37   :  { %99 = vmatprep.subr.mxu0 %v42_v29 }
  0x38   :  { %100 = vmatpush1.msra.mxu0 %v41_v30 }
  0x39   :  { %101 = vmatprep.subr.mxu0 %v40_v31 }
  0x3a   :  { %102 = vmatpush1.msra.mxu0 %v39_v32 }
  0x3b   :  { %136 = vmatmul.mubr.f32.vlgmr.msra.gmra.mxu0 %v38_v33 }
  0xfb   :  { %v137_v34 = vpop.f32.mrf.mxu0 }
  0xfc   :  { %142 = vst [vmem:[#allocation7] sm:$0xff] %v137_v34 }
  0xfd   :  { %v139_v35 = vpop.f32.mrf.mxu0 }
  0xfe   :  { %143 = vst [vmem:[#allocation7 + $0x8] sm:$0xff] %v139_v35 }
  0xff   :  { %217 = shalt.err (!%p214_p0)
}
 0x100   :  { %153 = dma.vmem_to_hbm [thread:$0]  %s151_s1, 256, %s264_s2, [#allocation4]  }
 0x101   :  { %230 = dma.done.wait [#allocation4], 256  }
 0x102   :  { %231 = vsyncadd [#allocation4], 4294967040 }
 0x103   :  { %157 = vsyncpa [#allocation3], 1 }
 0x104   :  { %158 = vsyncpa [#allocation6], 1 }
 0x105   :  { %159 = vsyncpa [#allocation4], 1 }

</bundles_post_ra>
